<compile_context>
chip_gen: v6e
topology: v6e:2x2x1
jax: 0.10.0
libtpu: 0.0.40
codegen_flags: <defaults>
</compile_context>

<pallas_src>
import jax
import jax.numpy as jnp
from jax.experimental import pallas as pl
from jax.experimental.pallas import tpu as pltpu


def _logreg_kernel(x_ref, w_ref, b_ref, o_ref):
    # x_ref: [TM, F] (native dtype, VMEM)
    # w_ref: [1, F]  (native dtype, VMEM, same tile every grid step)
    # b_ref: [1, 1]  (f32, SMEM scalar)
    # o_ref: [TM, 1]
    x = x_ref[...].astype(jnp.float32)
    w = w_ref[...].astype(jnp.float32)
    # VPU elementwise multiply + XLU lane reduction (avoids a 1-column MXU matmul).
    z = jnp.sum(x * w, axis=-1, keepdims=True) + b_ref[0, 0]
    o_ref[...] = jax.nn.sigmoid(z).astype(o_ref.dtype)


def _pick_block_rows(n, f, itemsize, budget_bytes=8 << 20):
    """Largest batch tile such that a double-buffered x tile stays well under
    the scoped-VMEM default on every chip generation (v7x has only 32 MiB)."""
    max_rows = max(8, budget_bytes // (2 * f * itemsize))
    tm = min(2048, max_rows)
    tm = max(8, (tm // 8) * 8)          # sublane-aligned
    n_up = ((n + 7) // 8) * 8
    return min(tm, n_up)


def logistic_regression(x, weight, bias, *, block_rows=None):
    """sigmoid(x @ weight.T + bias).

    x:      [N, F]  (f32 or bf16 -- read in native dtype)
    weight: [1, F]  (torch nn.Linear layout, no transpose needed)
    bias:   [1]
    returns [N, 1]  in x.dtype
    """
    n, f = x.shape
    assert weight.shape == (1, f)

    tm = block_rows if block_rows is not None else _pick_block_rows(
        n, f, x.dtype.itemsize)
    n_pad = pl.cdiv(n, tm) * tm
    if n_pad != n:
        x = jnp.pad(x, ((0, n_pad - n), (0, 0)))

    b = jnp.asarray(bias, jnp.float32).reshape(1, 1)

    out = pl.pallas_call(
        _logreg_kernel,
        out_shape=jax.ShapeDtypeStruct((n_pad, 1), x.dtype),
        grid=(n_pad // tm,),
        in_specs=[
            pl.BlockSpec((tm, f), lambda i: (i, 0)),                # x tiles
            pl.BlockSpec((1, f), lambda i: (0, 0)),                 # weight (resident)
            pl.BlockSpec(memory_space=pltpu.MemorySpace.SMEM),      # bias scalar
        ],
        out_specs=pl.BlockSpec((tm, 1), lambda i: (i, 0)),
        compiler_params=pltpu.CompilerParams(
            dimension_semantics=("parallel",),   # megacore sharding on v7x
        ),
    )(x, weight, b)

    # TODO(synk): if the masked (lane-sparse, last-dim=1) store ever shows up in
    # the bundle for huge N, emit a lane-dense [num_tiles, TM] output instead.
    return out[:n]


if __name__ == "__main__":
    key = jax.random.PRNGKey(0)
    kx, kw, kb, kx2 = jax.random.split(key, 4)

    # Shapes implied by the module: batch=8, n_input_features=32.
    N, F = 8, 32
    bound = 1.0 / float(F) ** 0.5
    x = jax.random.normal(kx, (N, F), dtype=jnp.float32)
    # nn.Linear(F, 1) parameter shapes / default uniform init.
    weight = jax.random.uniform(kw, (1, F), minval=-bound, maxval=bound,
                                dtype=jnp.float32)
    bias = jax.random.uniform(kb, (1,), minval=-bound, maxval=bound,
                              dtype=jnp.float32)

    out = jax.block_until_ready(logistic_regression(x, weight, bias))
    ref = jax.nn.sigmoid((x * weight).sum(axis=-1, keepdims=True) + bias)
    assert out.shape == (N, 1)
    assert jnp.allclose(out, ref, atol=1e-6, rtol=1e-6)

    # Exercise the gridded / padded path (N not a multiple of the tile size).
    N2 = 300
    x2 = jax.random.normal(kx2, (N2, F), dtype=jnp.float32)
    out2 = jax.block_until_ready(
        logistic_regression(x2, weight, bias, block_rows=128))
    ref2 = jax.nn.sigmoid((x2 * weight).sum(axis=-1, keepdims=True) + bias)
    assert out2.shape == (N2, 1)
    assert jnp.allclose(out2, ref2, atol=1e-6, rtol=1e-6)

    print("KERNEL_OK")
</pallas_src>

<mosaic_0001>
module attributes {stable_mosaic.version = 11 : i64} {
  func.func @_logreg_kernel(%arg0: i32, %arg1: memref<8x32xf32, #tpu.memory_space<vmem>>, %arg2: memref<1x32xf32, #tpu.memory_space<vmem>>, %arg3: memref<1x1xf32, #tpu.memory_space<smem>>, %arg4: memref<8x1xf32, #tpu.memory_space<vmem>>) attributes {dimension_semantics = [#tpu.dimension_semantics<parallel>], iteration_bounds = array<i64: 1>, scalar_prefetch = 0 : i64, scratch_operands = 0 : i64, tpu.core_type = #tpu.core_type<tc>, window_params = [{transform_indices = @transform_0, window_bounds = array<i64: 8, 32>}, {pipeline_mode = #tpu.pipeline_mode<synchronous>, transform_indices = @transform_1, window_bounds = array<i64: 1, 32>}, {transform_indices = @transform_2, window_bounds = array<i64: 1, 1>}, {transform_indices = @transform_3, window_bounds = array<i64: 8, 1>}]} {
    %c0 = arith.constant 0 : index
    %c0_0 = arith.constant 0 : index
    %0 = vector.load %arg1[%c0, %c0_0] : memref<8x32xf32, #tpu.memory_space<vmem>>, vector<8x32xf32>
    %c0_1 = arith.constant 0 : index
    %c0_2 = arith.constant 0 : index
    %1 = vector.load %arg2[%c0_1, %c0_2] : memref<1x32xf32, #tpu.memory_space<vmem>>, vector<1x32xf32>
    %2 = vector.broadcast %1 : vector<1x32xf32> to vector<8x32xf32>
    %3 = arith.mulf %0, %2 : vector<8x32xf32>
    %cst = arith.constant dense<0.000000e+00> : vector<8xf32>
    %4 = vector.multi_reduction <add>, %3, %cst [1] : vector<8x32xf32> to vector<8xf32>
    %5 = vector.shape_cast %4 : vector<8xf32> to vector<8x1xf32>
    %c0_3 = arith.constant 0 : index
    %c0_4 = arith.constant 0 : index
    %6 = memref.load %arg3[%c0_3, %c0_4] : memref<1x1xf32, #tpu.memory_space<smem>>
    %7 = vector.broadcast %6 : f32 to vector<8x1xf32>
    %8 = arith.addf %5, %7 : vector<8x1xf32>
    %9 = arith.negf %8 : vector<8x1xf32>
    %10 = math.exp %9 : vector<8x1xf32>
    %cst_5 = arith.constant 1.000000e+00 : f32
    %11 = vector.broadcast %cst_5 : f32 to vector<8x1xf32>
    %12 = arith.addf %11, %10 : vector<8x1xf32>
    %13 = arith.divf %11, %12 : vector<8x1xf32>
    %c0_6 = arith.constant 0 : index
    %c0_7 = arith.constant 0 : index
    %14 = vector.load %arg4[%c0_6, %c0_7] : memref<8x1xf32, #tpu.memory_space<vmem>>, vector<8x1xf32>
    tpu.vector_store %arg4[%c0_6, %c0_7], %13 {strides = array<i32>} : memref<8x1xf32, #tpu.memory_space<vmem>>, vector<8x1xf32>,
    return
  }
  func.func @transform_0(%arg0: i32) -> (i32, i32) {
    %c0_i32 = arith.constant 0 : i32
    %c0_i32_0 = arith.constant 0 : i32
    return %arg0, %c0_i32 : i32, i32
  }
  func.func @transform_1(%arg0: i32) -> (i32, i32) {
    %c0_i32 = arith.constant 0 : i32
    %c0_i32_0 = arith.constant 0 : i32
    %c0_i32_1 = arith.constant 0 : i32
    return %c0_i32, %c0_i32_0 : i32, i32
  }
  func.func @transform_2(%arg0: i32) -> (i32, i32) {
    %c0_i32 = arith.constant 0 : i32
    %c0_i32_0 = arith.constant 0 : i32
    %c0_i32_1 = arith.constant 0 : i32
    return %c0_i32, %c0_i32_0 : i32, i32
  }
  func.func @transform_3(%arg0: i32) -> (i32, i32) {
    %c0_i32 = arith.constant 0 : i32
    %c0_i32_0 = arith.constant 0 : i32
    return %arg0, %c0_i32 : i32, i32
  }
}

</mosaic_0001>

<bundles_post_ra>
// kernel: tpu_custom_call.1
= control target key start
LH: loop header
LB: loop body
LE: loop exit
PB: predicated region body
PF: predicated region fallthrough
CT: control target
= control target key end

     0   :  { %9 = vsyncpa [#allocation4], 0  ;;  %s85_s12 = smov [#allocation3]   ;;  %s118_s0 = inlined_call_operand.hbm [shape: f32[8,32], index: 0, kind: input, shape index: {}]   ;;  %s119_s1 = inlined_call_operand.vmem [shape: f32[1,32], index: 1, kind: input, shape index: {}]   ;;  %s120_s2 = inlined_call_operand.<no memory space> [shape: f32[1,1], index: 2, kind: input, shape index: {}]   ;;  %s121_s3 = inlined_call_operand.vmem [shape: f32[8,1], index: 3, kind: output, shape index: {}]  }
   0x1   :  { %s16_s13 = sshll.u32 %s85_s12, 4  ;;  %s17_s13 = int_to_ptr.vmem [resolvable:$true] %s16_s13 }
   0x2   :  { %s71_s14 = scalar_lea.vmem %s17_s13, 128  ;;  %p76_p1 = scmp.lt.s32.totalorder %s17_s13, %s17_s13 }
   0x3   :  { %p72_p0 = scmp.ne.s32.totalorder %s17_s13, %s71_s14  ;;  %p77_p2 = scmp.lt.s32.totalorder %s71_s14, %s71_s14 }
   0x5   :  { %p78_p3 = por %p77_p2, %p76_p1 }
   0x7   :  { %p79_p4 = pnand %p78_p3, %p72_p0 }
   0x9   :  { %82 = shalt.err (!%p79_p4)
}
   0xa   :  { %19 = dma.hbm_to_vmem [thread:$0]  %s118_s0, 128, %s17_s13, [#allocation4]  }
   0xb   :  { %83 = dma.done.wait [#allocation4], 128  }
   0xc   :  { %84 = vsyncadd [#allocation4], 4294967168  ;;  %v27_v0 = vld [vmem:[#allocation3] sm:$0xff]  ;;  %vm36_vm0 = vcmask 261120   ;;  %v41_v4 = vstv %s120_s2  ;;  %vm49_vm1 = vcmask 7168  }
   0xd   :  { %v56_v1 = vld [vmem:[%s119_s1] ss:$0 sm:$0xff] }
   0xe   :  { %v35_v2 = vmul.f32 %v56_v1, %v27_v0 }
  0x10   :  { %v37_v3 = vsel %vm36_vm0, %v35_v2, 0.0 }
  0x11   :  { %38 = vadd.xlane.f32.xlu0 %v37_v3 }
  0x9a   :  { %v39_v5 = vpop.xlane.xlu0 %38 }
  0x9b   :  { %v42_v6 = vadd.f32 %v41_v4, %v39_v5 }
  0x9d   :  { %v57_v7 = vmul.f32 -1.442695, %v42_v6 }
  0x9f   :  { %59 = vpow2.f32 %v57_v7 }
  0xac   :  { %v60_v8 = vpop.eup %59 }
  0xad   :  { %v46_v9 = vadd.f32 1.0, %v60_v8 }
  0xaf   :  { %61 = vrcp.f32 %v46_v9 }
  0xbc   :  { %v62_v10 = vpop.eup %61 }
  0xbd   :  { %50 = vst.msk [vmem:[%s121_s3] sm:$0xff] %vm49_vm1, %v62_v10 }
  0xbe   :  { %55 = vsyncpa [#allocation4], 1 }

</bundles_post_ra>
